<compile_context>
chip_gen: v7x
topology: tpu7x:2x2x1
jax: 0.10.0
libtpu: 0.0.40
codegen_flags: <defaults>
</compile_context>

<pallas_src>
import jax
import jax.numpy as jnp
from jax.experimental import pallas as pl
from jax.experimental.pallas import tpu as pltpu

PACK = 8      # rows packed per kernel row: (N, 12) -> (N/8, 96)
IN_F = 12
HID_F = 16
OUT_F = 3


def _round_up(a: int, b: int) -> int:
    return (a + b - 1) // b * b


def mlp_kernel(xp_ref, w1_ref, b1_ref, w2_ref, b2_ref, o_ref):
    # xp_ref: (TP, 96)   x-stream dtype (f32 or bf16), 8 rows packed per kernel row
    # w1_ref: (96, 128)  compute dtype, block-diagonal of w1.T (8 copies)
    # b1_ref: (1, 128)   f32, b1 tiled 8x
    # w2_ref: (128, 24)  compute dtype, block-diagonal of w2.T (8 copies)
    # b2_ref: (1, 24)    f32, b2 tiled 8x
    # o_ref : (TP, 24)   f32 packed output (free-reshaped to (8*TP, 3) outside)
    xp = xp_ref[...]
    if xp.dtype != w1_ref.dtype:
        xp = xp.astype(w1_ref.dtype)        # cheap per-vreg cast; single-pass bf16 MXU
    h = jnp.dot(xp, w1_ref[...], preferred_element_type=jnp.float32)
    h = jnp.maximum(h + b1_ref[...], 0.0)   # bias + ReLU on the f32 accumulator (VPU)
    y = jnp.dot(h.astype(w2_ref.dtype), w2_ref[...],
                preferred_element_type=jnp.float32)
    o_ref[...] = (y + b2_ref[...]).astype(o_ref.dtype)


def model2_forward(x, w1, b1, w2, b2, *, compute_dtype=jnp.bfloat16,
                   tile_rows=65536):
    """y = relu(x @ w1.T + b1) @ w2.T + b2   with PyTorch-layout weights.

    x : (N, 12) f32 or bf16 (bf16 halves the dominant HBM read)
    w1: (16, 12), b1: (16,), w2: (3, 16), b2: (3,)
    Returns (N, 3) f32.
    """
    n, k_in = x.shape
    assert k_in == IN_F and w1.shape == (HID_F, IN_F) and w2.shape == (OUT_F, HID_F)

    # ---- pack weights block-diagonally once (tiny, grid-resident, MXU-oriented) ----
    eye = jnp.eye(PACK, dtype=jnp.float32)
    w1p = jnp.kron(eye, w1.T.astype(jnp.float32)).astype(compute_dtype)   # (96, 128)
    w2p = jnp.kron(eye, w2.T.astype(jnp.float32)).astype(compute_dtype)   # (128, 24)
    b1p = jnp.tile(b1.astype(jnp.float32), PACK).reshape(1, PACK * HID_F)  # (1, 128)
    b2p = jnp.tile(b2.astype(jnp.float32), PACK).reshape(1, PACK * OUT_F)  # (1, 24)

    # ---- pad batch only to packing granularity (64 rows), never to tile multiples ----
    n_pad = _round_up(max(n, 1), PACK * 8)
    if n_pad != n:
        x = jnp.pad(x, ((0, n_pad - n), (0, 0)))
    p = n_pad // PACK
    xp = x.reshape(p, PACK * IN_F)          # row-major reshape: free bitcast

    tile_p = min(max(tile_rows // PACK, 8), p)   # p and tile_rows//PACK are mult. of 8
    grid = (pl.cdiv(p, tile_p),)                 # partial last block masked by Pallas

    x_itemsize = jnp.dtype(x.dtype).itemsize
    cost = pl.CostEstimate(
        flops=p * (2 * (PACK * IN_F) * (PACK * HID_F)
                   + 2 * (PACK * HID_F) * (PACK * OUT_F)),
        transcendentals=0,
        bytes_accessed=n_pad * IN_F * x_itemsize + n_pad * OUT_F * 4
        + (PACK * IN_F * PACK * HID_F + PACK * HID_F * PACK * OUT_F)
        * jnp.dtype(compute_dtype).itemsize
        + PACK * (HID_F + OUT_F) * 4,
    )

    out_p = pl.pallas_call(
        mlp_kernel,
        out_shape=jax.ShapeDtypeStruct((p, PACK * OUT_F), jnp.float32),
        grid_spec=pltpu.PrefetchScalarGridSpec(
            num_scalar_prefetch=0,
            grid=grid,
            in_specs=[
                pl.BlockSpec((tile_p, PACK * IN_F), lambda i: (i, 0)),        # x tiles
                pl.BlockSpec((PACK * IN_F, PACK * HID_F), lambda i: (0, 0)),  # W1' resident
                pl.BlockSpec((1, PACK * HID_F), lambda i: (0, 0)),            # b1 resident
                pl.BlockSpec((PACK * HID_F, PACK * OUT_F), lambda i: (0, 0)), # W2' resident
                pl.BlockSpec((1, PACK * OUT_F), lambda i: (0, 0)),            # b2 resident
            ],
            out_specs=pl.BlockSpec((tile_p, PACK * OUT_F), lambda i: (i, 0)),
        ),
        compiler_params=pltpu.CompilerParams(
            dimension_semantics=("parallel",),       # batch tiles independent (megacore)
            vmem_limit_bytes=48 * 1024 * 1024,       # ~16 MiB actually used at 64K rows
        ),
        cost_estimate=cost,
    )(xp, w1p, b1p, w2p, b2p)

    # Free reshape back to (n_pad, 3); contiguous prefix slice drops pad rows.
    return out_p.reshape(n_pad, OUT_F)[:n]


def init_params(key):
    # PyTorch nn.Linear default init: U(-1/sqrt(fan_in), 1/sqrt(fan_in)), weight (out, in).
    k1, k2, k3, k4 = jax.random.split(key, 4)
    bound1 = 1.0 / jnp.sqrt(12.0)
    bound2 = 1.0 / jnp.sqrt(16.0)
    w1 = jax.random.uniform(k1, (HID_F, IN_F), jnp.float32, -bound1, bound1)
    b1 = jax.random.uniform(k2, (HID_F,), jnp.float32, -bound1, bound1)
    w2 = jax.random.uniform(k3, (OUT_F, HID_F), jnp.float32, -bound2, bound2)
    b2 = jax.random.uniform(k4, (OUT_F,), jnp.float32, -bound2, bound2)
    return w1, b1, w2, b2


def _reference(x, w1, b1, w2, b2):
    hp = jax.lax.Precision.HIGHEST
    h = jnp.maximum(jnp.dot(x, w1.T, precision=hp) + b1, 0.0)
    return jnp.dot(h, w2.T, precision=hp) + b2


if __name__ == "__main__":
    key = jax.random.PRNGKey(0)
    k_x, k_p = jax.random.split(key)

    n = 4  # small smoke-test batch; Model2's fc expects 12 input features
    x = jax.random.normal(k_x, (n, IN_F), jnp.float32)
    w1, b1, w2, b2 = init_params(k_p)

    ref = _reference(x, w1, b1, w2, b2)

    # f32 compute path (tight-tolerance check of the forward semantics)
    out_f32 = model2_forward(x, w1, b1, w2, b2, compute_dtype=jnp.float32)
    jax.block_until_ready(out_f32)
    assert out_f32.shape == (n, OUT_F)
    assert jnp.allclose(out_f32, ref, rtol=2e-3, atol=2e-3)

    # default bf16 compute path (f32 x stream, bf16 MXU, f32 accumulation)
    out_bf16 = model2_forward(x, w1, b1, w2, b2)
    jax.block_until_ready(out_bf16)
    assert out_bf16.shape == (n, OUT_F)
    assert jnp.allclose(out_bf16, ref, rtol=5e-2, atol=5e-2)

    # bf16 HBM stream (the intended large-batch config: halves the x read bytes)
    out_stream = model2_forward(x.astype(jnp.bfloat16), w1, b1, w2, b2)
    jax.block_until_ready(out_stream)
    assert out_stream.shape == (n, OUT_F)
    assert jnp.allclose(out_stream, ref, rtol=5e-2, atol=5e-2)

    print("KERNEL_OK")
</pallas_src>

<mosaic_0001>
module attributes {stable_mosaic.version = 11 : i64} {
  func.func @mlp_kernel(%arg0: i32, %arg1: memref<8x96xf32, #tpu.memory_space<vmem>>, %arg2: memref<96x128xf32, #tpu.memory_space<vmem>>, %arg3: memref<1x128xf32, #tpu.memory_space<vmem>>, %arg4: memref<128x24xf32, #tpu.memory_space<vmem>>, %arg5: memref<1x24xf32, #tpu.memory_space<vmem>>, %arg6: memref<8x24xf32, #tpu.memory_space<vmem>>) attributes {dimension_semantics = [#tpu.dimension_semantics<parallel>], iteration_bounds = array<i64: 1>, scalar_prefetch = 0 : i64, scratch_operands = 0 : i64, tpu.core_type = #tpu.core_type<tc>, window_params = [{transform_indices = @transform_0, window_bounds = array<i64: 8, 96>}, {pipeline_mode = #tpu.pipeline_mode<synchronous>, transform_indices = @transform_1, window_bounds = array<i64: 96, 128>}, {pipeline_mode = #tpu.pipeline_mode<synchronous>, transform_indices = @transform_2, window_bounds = array<i64: 1, 128>}, {pipeline_mode = #tpu.pipeline_mode<synchronous>, transform_indices = @transform_3, window_bounds = array<i64: 128, 24>}, {pipeline_mode = #tpu.pipeline_mode<synchronous>, transform_indices = @transform_4, window_bounds = array<i64: 1, 24>}, {transform_indices = @transform_5, window_bounds = array<i64: 8, 24>}]} {
    %c0 = arith.constant 0 : index
    %c0_0 = arith.constant 0 : index
    %0 = vector.load %arg1[%c0, %c0_0] : memref<8x96xf32, #tpu.memory_space<vmem>>, vector<8x96xf32>
    %c0_1 = arith.constant 0 : index
    %c0_2 = arith.constant 0 : index
    %1 = vector.load %arg2[%c0_1, %c0_2] : memref<96x128xf32, #tpu.memory_space<vmem>>, vector<96x128xf32>
    %cst = arith.constant dense<0.000000e+00> : vector<8x128xf32>
    %2 = tpu.matmul %0, %1, %cst {dimension_numbers = #tpu.dot_dimension_numbers<[1], [0], [0], [1], [0, 0, 1, 1], [], []>} : vector<8x96xf32>, vector<96x128xf32>, vector<8x128xf32> -> vector<8x128xf32>
    %c0_3 = arith.constant 0 : index
    %c0_4 = arith.constant 0 : index
    %3 = vector.load %arg3[%c0_3, %c0_4] : memref<1x128xf32, #tpu.memory_space<vmem>>, vector<1x128xf32>
    %4 = vector.broadcast %3 : vector<1x128xf32> to vector<8x128xf32>
    %5 = arith.addf %2, %4 : vector<8x128xf32>
    %cst_5 = arith.constant 0.000000e+00 : f32
    %6 = vector.broadcast %cst_5 : f32 to vector<8x128xf32>
    %7 = arith.maximumf %5, %6 : vector<8x128xf32>
    %c0_6 = arith.constant 0 : index
    %c0_7 = arith.constant 0 : index
    %8 = vector.load %arg4[%c0_6, %c0_7] : memref<128x24xf32, #tpu.memory_space<vmem>>, vector<128x24xf32>
    %cst_8 = arith.constant dense<0.000000e+00> : vector<8x24xf32>
    %9 = tpu.matmul %7, %8, %cst_8 {dimension_numbers = #tpu.dot_dimension_numbers<[1], [0], [0], [1], [0, 0, 1, 1], [], []>} : vector<8x128xf32>, vector<128x24xf32>, vector<8x24xf32> -> vector<8x24xf32>
    %c0_9 = arith.constant 0 : index
    %c0_10 = arith.constant 0 : index
    %10 = vector.load %arg5[%c0_9, %c0_10] : memref<1x24xf32, #tpu.memory_space<vmem>>, vector<1x24xf32>
    %11 = vector.broadcast %10 : vector<1x24xf32> to vector<8x24xf32>
    %12 = arith.addf %9, %11 : vector<8x24xf32>
    %c0_11 = arith.constant 0 : index
    %c0_12 = arith.constant 0 : index
    %13 = vector.load %arg6[%c0_11, %c0_12] : memref<8x24xf32, #tpu.memory_space<vmem>>, vector<8x24xf32>
    tpu.vector_store %arg6[%c0_11, %c0_12], %12 {strides = array<i32>} : memref<8x24xf32, #tpu.memory_space<vmem>>, vector<8x24xf32>,
    return
  }
  func.func @transform_0(%arg0: i32) -> (i32, i32) {
    %c0_i32 = arith.constant 0 : i32
    %c0_i32_0 = arith.constant 0 : i32
    return %arg0, %c0_i32 : i32, i32
  }
  func.func @transform_1(%arg0: i32) -> (i32, i32) {
    %c0_i32 = arith.constant 0 : i32
    %c0_i32_0 = arith.constant 0 : i32
    %c0_i32_1 = arith.constant 0 : i32
    return %c0_i32, %c0_i32_0 : i32, i32
  }
  func.func @transform_2(%arg0: i32) -> (i32, i32) {
    %c0_i32 = arith.constant 0 : i32
    %c0_i32_0 = arith.constant 0 : i32
    %c0_i32_1 = arith.constant 0 : i32
    return %c0_i32, %c0_i32_0 : i32, i32
  }
  func.func @transform_3(%arg0: i32) -> (i32, i32) {
    %c0_i32 = arith.constant 0 : i32
    %c0_i32_0 = arith.constant 0 : i32
    %c0_i32_1 = arith.constant 0 : i32
    return %c0_i32, %c0_i32_0 : i32, i32
  }
  func.func @transform_4(%arg0: i32) -> (i32, i32) {
    %c0_i32 = arith.constant 0 : i32
    %c0_i32_0 = arith.constant 0 : i32
    %c0_i32_1 = arith.constant 0 : i32
    return %c0_i32, %c0_i32_0 : i32, i32
  }
  func.func @transform_5(%arg0: i32) -> (i32, i32) {
    %c0_i32 = arith.constant 0 : i32
    %c0_i32_0 = arith.constant 0 : i32
    return %arg0, %c0_i32 : i32, i32
  }
}

</mosaic_0001>

<bundles_post_ra>
// kernel: tpu_custom_call.1
= control target key start
LH: loop header
LB: loop body
LE: loop exit
PB: predicated region body
PF: predicated region fallthrough
CT: control target
= control target key end

     0   :  { %v390_v3 = vmov 0.0|0.0   ;;  %vm391_vm0 = vmmov 0   ;;  %v392_v6 = vmov 0.0   ;;  %s543_s0 = inlined_call_operand.vmem [shape: f32[8,96], index: 0, kind: input, shape index: {}]   ;;  %s544_s1 = inlined_call_operand.vmem [shape: f32[96,128], index: 1, kind: input, shape index: {}]   ;;  %s545_s2 = inlined_call_operand.vmem [shape: f32[1,128], index: 2, kind: input, shape index: {}]   ;;  %s546_s3 = inlined_call_operand.vmem [shape: f32[128,24], index: 3, kind: input, shape index: {}]   ;;  %s547_s4 = inlined_call_operand.vmem [shape: f32[1,24], index: 4, kind: input, shape index: {}]   ;;  %s548_s5 = inlined_call_operand.hbm [shape: f32[8,24], index: 5, kind: output, shape index: {}]  }
   0x1   :  { %v22_v0 = vld [vmem:[%s544_s1] sm:$0xff]  ;;  %v23_v1 = vld [vmem:[%s544_s1 + $0x8] sm:$0xff]  ;;  %v24_v2 = vld [vmem:[%s544_s1 + $0x10] sm:$0xff]  ;;  %320 = vmatprep.subr.bf16.mxu0 %v390_v3  ;;  %282 = vmatprep.mubr.msk.f32.mxu0 %vm391_vm0, %v392_v6 }
   0x2   :  { %v321_v4 = vpack.c.bf16 %v23_v1, %v22_v0  ;;  %v25_v5 = vld [vmem:[%s544_s1 + $0x18] sm:$0xff]  ;;  %338 = vmatprep.subr.bf16.mxu1 %v390_v3  ;;  %317 = vmatprep.mubr.msk.f32.mxu1 %vm391_vm0, %v392_v6  ;;  %v26_v8 = vld [vmem:[%s544_s1 + $0x20] sm:$0xff]  ;;  %v27_v9 = vld [vmem:[%s544_s1 + $0x28] sm:$0xff] }
   0x3   :  { %v324_v7 = vpack.c.bf16 %v25_v5, %v24_v2  ;;  %v116_v10 = vld [vmem:[%s546_s3] sm:$0xff]  ;;  %v117_v11 = vld [vmem:[%s546_s3 + $0x8] sm:$0xff]  ;;  %v118_v13 = vld [vmem:[%s546_s3 + $0x10] sm:$0xff]  ;;  %v327_v15 = vpack.c.bf16 %v27_v9, %v26_v8 }
   0x4   :  { %322 = vmatpush3.bf16.msra.mxu0 %v321_v4  ;;  %v339_v12 = vpack.c.bf16 %v117_v11, %v116_v10  ;;  %v119_v14 = vld [vmem:[%s546_s3 + $0x18] sm:$0xff]  ;;  %v28_v16 = vld [vmem:[%s544_s1 + $0x30] sm:$0xff]  ;;  %v120_v19 = vld [vmem:[%s546_s3 + $0x20] sm:$0xff] }
   0x5   :  { %323 = vmatprep.subr.bf16.mxu0 %v390_v3  ;;  %v342_v17 = vpack.c.bf16 %v119_v14, %v118_v13  ;;  %v29_v18 = vld [vmem:[%s544_s1 + $0x38] sm:$0xff]  ;;  %v121_v20 = vld [vmem:[%s546_s3 + $0x28] sm:$0xff] }
   0x6   :  { %340 = vmatpush3.bf16.msra.mxu1 %v339_v12 }
   0x7   :  { %341 = vmatprep.subr.bf16.mxu1 %v390_v3 }
   0x8   :  { %325 = vmatpush3.bf16.msra.mxu0 %v324_v7 }
   0x9   :  { %326 = vmatprep.subr.bf16.mxu0 %v390_v3 }
   0xa   :  { %10 = vsyncpa [#allocation3], 0  ;;  %v330_v21 = vpack.c.bf16 %v29_v18, %v28_v16  ;;  %v30_v22 = vld [vmem:[%s544_s1 + $0x40] sm:$0xff]  ;;  %343 = vmatpush3.bf16.msra.mxu1 %v342_v17  ;;  %v345_v23 = vpack.c.bf16 %v121_v20, %v120_v19  ;;  %v31_v24 = vld [vmem:[%s544_s1 + $0x48] sm:$0xff]  ;;  %vm41_vm1 = vcmask 785408   ;;  %s393_s28 = smov [#allocation2]  }
   0xb   :  { %344 = vmatprep.subr.bf16.mxu1 %v390_v3  ;;  %v122_v25 = vld [vmem:[%s546_s3 + $0x30] sm:$0xff]  ;;  %v123_v26 = vld [vmem:[%s546_s3 + $0x38] sm:$0xff]  ;;  %v333_v27 = vpack.c.bf16 %v31_v24, %v30_v22  ;;  %v124_v31 = vld [vmem:[%s546_s3 + $0x40] sm:$0xff]  ;;  %s217_s29 = sshll.u32 %s393_s28, 4  ;;  %vm209_vm2 = vcmask 195584   ;;  %s218_s29 = int_to_ptr.vmem [resolvable:$true] %s217_s29 }
   0xc   :  { %328 = vmatpush3.bf16.msra.mxu0 %v327_v15  ;;  %v32_v28 = vld [vmem:[%s544_s1 + $0x50] sm:$0xff]  ;;  %v348_v29 = vpack.c.bf16 %v123_v26, %v122_v25  ;;  %v33_v30 = vld [vmem:[%s544_s1 + $0x58] sm:$0xff]  ;;  %v125_v32 = vld [vmem:[%s546_s3 + $0x48] sm:$0xff]  ;;  %p371_p1 = scmp.lt.s32.totalorder %s218_s29, %s218_s29 }
   0xd   :  { %329 = vmatprep.subr.bf16.mxu0 %v390_v3  ;;  %v336_v33 = vpack.c.bf16 %v33_v30, %v32_v28  ;;  %v351_v34 = vpack.c.bf16 %v125_v32, %v124_v31  ;;  %v126_v35 = vld [vmem:[%s546_s3 + $0x50] sm:$0xff]  ;;  %v127_v36 = vld [vmem:[%s546_s3 + $0x58] sm:$0xff]  ;;  %v21_v37 = vld [vmem:[%s543_s0] sm:$0xff] }
   0xe   :  { %346 = vmatpush3.bf16.msra.mxu1 %v345_v23  ;;  %v354_v38 = vpack.c.bf16 %v127_v36, %v126_v35  ;;  %v128_v39 = vld [vmem:[%s546_s3 + $0x60] sm:$0xff]  ;;  %v129_v40 = vld [vmem:[%s546_s3 + $0x68] sm:$0xff]  ;;  %v130_v42 = vld [vmem:[%s546_s3 + $0x70] sm:$0xff] }
   0xf   :  { %347 = vmatprep.subr.bf16.mxu1 %v390_v3  ;;  %v357_v41 = vpack.c.bf16 %v129_v40, %v128_v39  ;;  %v131_v43 = vld [vmem:[%s546_s3 + $0x78] sm:$0xff]  ;;  %v225_v45 = vld [vmem:[%s545_s2] ss:$0 sm:$0xff]  ;;  %s366_s3 = scalar_lea.vmem %s218_s29, 128 }
  0x10   :  { %331 = vmatpush3.bf16.msra.mxu0 %v330_v21  ;;  %v360_v44 = vpack.c.bf16 %v131_v43, %v130_v42  ;;  %v227_v50 = vld [vmem:[%s547_s4] ss:$0 sm:$0xff]  ;;  %p367_p0 = scmp.ne.s32.totalorder %s218_s29, %s366_s3  ;;  %p372_p2 = scmp.lt.s32.totalorder %s366_s3, %s366_s3 }
  0x11   :  { %332 = vmatprep.subr.bf16.mxu0 %v390_v3 }
  0x12   :  { %349 = vmatpush3.bf16.msra.mxu1 %v348_v29  ;;  %p373_p3 = por %p372_p2, %p371_p1 }
  0x13   :  { %350 = vmatprep.subr.bf16.mxu1 %v390_v3 }
  0x14   :  { %334 = vmatpush3.bf16.msra.mxu0 %v333_v27  ;;  %p374_p4 = pnand %p373_p3, %p367_p0 }
  0x15   :  { %335 = vmatprep.subr.bf16.mxu0 %v390_v3 }
  0x16   :  { %352 = vmatpush3.bf16.msra.mxu1 %v351_v34 }
  0x17   :  { %353 = vmatprep.subr.bf16.mxu1 %v390_v3 }
  0x18   :  { %337 = vmatpush3.bf16.msra.mxu0 %v336_v33 }
  0x1a   :  { %355 = vmatpush3.bf16.msra.mxu1 %v354_v38 }
  0x1b   :  { %283 = vmatmul.mubr.msk.f32.vlgmr.msra.gmra.mrb[0].mxu0 %vm41_vm1, %v21_v37  ;;  %356 = vmatprep.subr.bf16.mxu1 %v390_v3 }
  0x1e   :  { %358 = vmatpush3.bf16.msra.mxu1 %v357_v41 }
  0x1f   :  { %359 = vmatprep.subr.bf16.mxu1 %v390_v3 }
  0x22   :  { %361 = vmatpush3.bf16.msra.mxu1 %v360_v44 }
  0xee   :  { %v111_v46 = vpop.f32.mrb[0].mxu0 }
  0xef   :  { %v112_v47 = vadd.f32 %v225_v45, %v111_v46  ;;  %v284_v48 = vpop.f32.mrb[1].mxu0 }
  0xf1   :  { %v115_v49 = vmax.f32 %v112_v47, 0.0 }
  0xf3   :  { %318 = vmatmul.mubr.f32.vlgmr.msra.gmra.mrb[0].mxu1 %v115_v49 }
 0x1c6   :  { %v205_v51 = vpop.f32.mrb[0].mxu1 }
 0x1c7   :  { %v206_v52 = vadd.f32 %v227_v50, %v205_v51  ;;  %v319_v53 = vpop.f32.mrb[1].mxu1 }
 0x1c9   :  { %210 = vst.msk [vmem:[#allocation2] sm:$0xff] %vm209_vm2, %v206_v52 }
 0x1ca   :  { %377 = shalt.err (!%p374_p4)
}
 0x1cb   :  { %s378_s6 = scalar_lea.hbm %s548_s5, 128 }
 0x1cc   :  { %p379_p5 = scmp.ne.s32.totalorder %s548_s5, %s378_s6  ;;  %p382_p6 = scmp.lt.u32.totalorder %s378_s6, %s548_s5 }
 0x1ce   :  { %p384_p7 = pnand %p382_p6, %p379_p5 }
 0x1d0   :  { %387 = shalt.err (!%p384_p7)
}
 0x1d1   :  { %220 = dma.vmem_to_hbm [thread:$0]  %s218_s29, 128, %s548_s5, [#allocation3]  }
 0x1d2   :  { %388 = dma.done.wait [#allocation3], 128  }
 0x1d3   :  { %389 = vsyncadd [#allocation3], 4294967168 }
 0x1d4   :  { %224 = vsyncpa [#allocation3], 1 }

</bundles_post_ra>
